<compile_context>
chip_gen: v7x
topology: tpu7x:2x2x1
jax: 0.10.0
libtpu: 0.0.40
codegen_flags: <defaults>
</compile_context>

<pallas_src>
import jax
import jax.numpy as jnp
from jax.experimental import pallas as pl
from jax.experimental.pallas import tpu as pltpu

_LANE_CANDIDATES = (1024, 512, 256, 128)        # lane-dense last dims

# Per-generation target bytes of *payload* per block (per operand).
_GEN_BLOCK_BYTES = {"v5": 2 << 20, "v6": 4 << 20, "v7": 8 << 20}
# Per-generation explicit scoped-VMEM limit (None => leave compiler default).
_GEN_VMEM_LIMIT = {"v5": None, "v6": 32 << 20, "v7": 48 << 20}
_DEFAULT_BLOCK_BYTES = 2 << 20


def _copy_kernel(x_ref, o_ref):
    # Whole-tile identity (streams the VMEM block back out).
    o_ref[...] = x_ref[...]


def _tpu_generation() -> str:
    try:
        kind = jax.devices()[0].device_kind.lower()
    except Exception:  # pragma: no cover - defensive
        return "unknown"
    for gen in ("v7", "v6", "v5"):
        if gen in kind:
            return gen
    return "unknown"


_CORE_PARALLEL_OK = None


def _core_parallel_supported() -> bool:
    """One-time probe: can this build/chip lower CORE_PARALLEL grid axes?"""
    global _CORE_PARALLEL_OK
    if _CORE_PARALLEL_OK is None:
        try:
            probe = jnp.zeros((8, 128), jnp.float32)
            out = pl.pallas_call(
                _copy_kernel,
                out_shape=jax.ShapeDtypeStruct((8, 128), jnp.float32),
                grid=(1,),
                in_specs=[pl.BlockSpec((8, 128), lambda i: (0, 0))],
                out_specs=pl.BlockSpec((8, 128), lambda i: (0, 0)),
                compiler_params=pltpu.CompilerParams(
                    dimension_semantics=(pltpu.CORE_PARALLEL,)),
            )(probe)
            jax.block_until_ready(out)
            _CORE_PARALLEL_OK = True
        except Exception:
            _CORE_PARALLEL_OK = False
    return _CORE_PARALLEL_OK


def _compiler_params(gen: str) -> pltpu.CompilerParams:
    sem = ("parallel",)
    if gen == "v7" and _core_parallel_supported():
        # Shard the copy tiles across v7x's 2 TensorCores (both DMA engines).
        sem = (pltpu.CORE_PARALLEL,)
    kwargs = dict(dimension_semantics=sem)
    vmem = _GEN_VMEM_LIMIT.get(gen)
    if vmem is not None:
        kwargs["vmem_limit_bytes"] = vmem
    return pltpu.CompilerParams(**kwargs)


def _sublane_multiple(dtype) -> int:
    # f32/int32 -> 8, bf16/f16 -> 16, int8/fp8 -> 32 (packed-tile constraint).
    itemsize = jnp.dtype(dtype).itemsize
    return 8 * max(1, 4 // itemsize)


def _copy_2d(flat2d: jax.Array, gen: str) -> jax.Array:
    """Tiled, pipelined identity copy of a lane-dense 2-D array."""
    rows, lane = flat2d.shape
    itemsize = jnp.dtype(flat2d.dtype).itemsize
    sub = _sublane_multiple(flat2d.dtype)
    block_bytes = _GEN_BLOCK_BYTES.get(gen, _DEFAULT_BLOCK_BYTES)

    target_rows = max(sub, block_bytes // (lane * itemsize))
    if rows <= target_rows:
        block_rows = rows                       # full second-to-last dim: allowed
    else:
        block_rows = (target_rows // sub) * sub  # dtype-aware sublane multiple

    grid = (pl.cdiv(rows, block_rows),)          # ragged last block masked by Pallas
    return pl.pallas_call(
        _copy_kernel,
        out_shape=jax.ShapeDtypeStruct((rows, lane), flat2d.dtype),
        grid=grid,
        in_specs=[pl.BlockSpec((block_rows, lane), lambda i: (i, 0))],
        out_specs=pl.BlockSpec((block_rows, lane), lambda i: (i, 0)),
        compiler_params=_compiler_params(gen),
    )(flat2d)


def _copy_ragged(flat: jax.Array, gen: str) -> jax.Array:
    """Identity copy for sizes not divisible by 128, as a (1, N) strip.

    Blocks tile the last dim in multiples of 128; the ragged final block is
    masked by Pallas (no jnp.pad / slice passes in the wrapper).  Block payload
    is capped because a single-sublane strip occupies 8x its bytes in VMEM.
    """
    (n,) = flat.shape
    itemsize = jnp.dtype(flat.dtype).itemsize
    quantum = 128 * max(1, 4 // itemsize)        # packed lane quantum
    payload_cap = 256 * 1024                     # 256 KiB payload -> ~8 MiB VMEM total
    target = max(quantum, payload_cap // itemsize)

    if n <= target:
        block_lane = n                           # full last dim: allowed
    else:
        block_lane = (target // quantum) * quantum

    x2d = flat.reshape(1, n)
    grid = (pl.cdiv(n, block_lane),)
    out = pl.pallas_call(
        _copy_kernel,
        out_shape=jax.ShapeDtypeStruct((1, n), flat.dtype),
        grid=grid,
        in_specs=[pl.BlockSpec((1, block_lane), lambda i: (0, i))],
        out_specs=pl.BlockSpec((1, block_lane), lambda i: (0, i)),
        compiler_params=_compiler_params(gen),
    )(x2d)
    return out.reshape(n)


@jax.jit
def _pallas_copy_impl(x: jax.Array) -> jax.Array:
    total = x.size
    gen = _tpu_generation()

    lane = None
    for cand in _LANE_CANDIDATES:
        if total % cand == 0:
            lane = cand
            break

    if lane is not None:
        out = _copy_2d(x.reshape(total // lane, lane), gen)
    else:
        out = _copy_ragged(x.reshape(-1), gen)
    return out.reshape(x.shape)


def pallas_identity_copy(x: jax.Array) -> jax.Array:
    """Materialized identity copy of x via a tiled Pallas streaming kernel."""
    x = jnp.asarray(x)
    if x.size == 0:
        return x
    return _pallas_copy_impl(x)


def tracker_forward(x: jax.Array) -> jax.Array:
    """Pallas/JAX equivalent of Tracker.forward: returns x unchanged.

    Fast path: a semantic identity never launches a kernel (zero HBM traffic).
    """
    return x


class Tracker:
    """JAX port of the PyTorch `Tracker` module."""

    def __init__(self, snapshot_with_pallas: bool = False):
        # TODO(synk): `self.x = x` is Python-side module state with no
        # functional JAX equivalent; it is kept as a host attribute.  When
        # `snapshot_with_pallas` is set, the stash is materialized through the
        # Pallas copy kernel so later buffer donation/reuse by the caller
        # cannot clobber the tracked value.
        self.x = None
        self._snapshot = snapshot_with_pallas

    def __call__(self, x: jax.Array) -> jax.Array:
        self.x = pallas_identity_copy(x) if self._snapshot else x
        return x                                 # fast path: no kernel launched


if __name__ == "__main__":
    key = jax.random.PRNGKey(0)

    # Small NCHW input consistent with the module's expected use.
    x = jax.random.normal(key, (2, 4, 16, 16), dtype=jnp.float32)
    tracker = Tracker(snapshot_with_pallas=True)
    y = tracker(x)
    jax.block_until_ready((y, tracker.x))
    assert y.shape == x.shape and y.dtype == x.dtype, (y.shape, y.dtype)
    assert bool(jnp.all(y == x)), "forward is not the identity (small input)"
    assert bool(jnp.all(tracker.x == x)), "Pallas snapshot mismatch (small input)"

    # Larger input exercising the multi-tile, pipelined, lane-dense path.
    x2 = jax.random.normal(jax.random.PRNGKey(1), (8, 16, 64, 128), dtype=jnp.float32)
    y2 = pallas_identity_copy(x2)
    jax.block_until_ready(y2)
    assert y2.shape == x2.shape and y2.dtype == x2.dtype
    assert bool(jnp.all(y2 == x2)), "identity kernel mismatch (tiled input)"

    # Size not divisible by 128 exercising the masked ragged-tail path.
    x3 = jax.random.normal(jax.random.PRNGKey(2), (3, 5, 7), dtype=jnp.float32)
    y3 = pallas_identity_copy(x3)
    jax.block_until_ready(y3)
    assert y3.shape == x3.shape and bool(jnp.all(y3 == x3)), "ragged path mismatch"

    print("KERNEL_OK")
</pallas_src>

<mosaic_0001>
module attributes {stable_mosaic.version = 11 : i64} {
  func.func @_copy_kernel(%arg0: i32, %arg1: memref<2x1024xf32, #tpu.memory_space<vmem>>, %arg2: memref<2x1024xf32, #tpu.memory_space<vmem>>) attributes {dimension_semantics = [#tpu.dimension_semantics<parallel>], iteration_bounds = array<i64: 1>, scalar_prefetch = 0 : i64, scratch_operands = 0 : i64, tpu.core_type = #tpu.core_type<tc>, window_params = [{transform_indices = @transform_0, window_bounds = array<i64: 2, 1024>}, {transform_indices = @transform_1, window_bounds = array<i64: 2, 1024>}]} {
    %c0 = arith.constant 0 : index
    %c0_0 = arith.constant 0 : index
    %0 = vector.load %arg1[%c0, %c0_0] : memref<2x1024xf32, #tpu.memory_space<vmem>>, vector<2x1024xf32>
    %c0_1 = arith.constant 0 : index
    %c0_2 = arith.constant 0 : index
    %1 = vector.load %arg2[%c0_1, %c0_2] : memref<2x1024xf32, #tpu.memory_space<vmem>>, vector<2x1024xf32>
    tpu.vector_store %arg2[%c0_1, %c0_2], %0 {strides = array<i32>} : memref<2x1024xf32, #tpu.memory_space<vmem>>, vector<2x1024xf32>,
    return
  }
  func.func @transform_0(%arg0: i32) -> (i32, i32) {
    %c0_i32 = arith.constant 0 : i32
    %c0_i32_0 = arith.constant 0 : i32
    return %arg0, %c0_i32 : i32, i32
  }
  func.func @transform_1(%arg0: i32) -> (i32, i32) {
    %c0_i32 = arith.constant 0 : i32
    %c0_i32_0 = arith.constant 0 : i32
    return %arg0, %c0_i32 : i32, i32
  }
}

</mosaic_0001>

<bundles_post_ra>
// kernel: _pallas_copy_impl.1
= control target key start
LH: loop header
LB: loop body
LE: loop exit
PB: predicated region body
PF: predicated region fallthrough
CT: control target
= control target key end

     0   :  { %s38_s0 = inlined_call_operand.vmem [shape: f32[2,1024], index: 0, kind: input, shape index: {}]   ;;  %s39_s1 = inlined_call_operand.vmem [shape: f32[2,1024], index: 1, kind: output, shape index: {}]  }
   0x1   :  { %v8_v0 = vld [vmem:[%s38_s0] sm:$0xff]  ;;  %v9_v1 = vld [vmem:[%s38_s0 + $0x8] sm:$0xff] }
   0x2   :  { %10 = vst [vmem:[%s39_s1] sm:$0xff] %v8_v0  ;;  %11 = vst [vmem:[%s39_s1 + $0x8] sm:$0xff] %v9_v1 }

</bundles_post_ra>
